<compile_context>
chip_gen: v7x
topology: tpu7x:2x2x1
jax: 0.10.0
libtpu: 0.0.40
codegen_flags: <defaults>
</compile_context>

<pallas_src>
import math

import jax
import jax.numpy as jnp
from jax.experimental import pallas as pl
from jax.experimental.pallas import tpu as pltpu


def _attention_kernel(hidp_ref, enc_ref, we_ref, v_ref, out_ref):
    # hidp_ref: (b_blk, H)     f32, precomputed hidden @ W_h.T + b
    # enc_ref:  (T, b_blk, H)  encoder outputs, native time-major layout
    # we_ref:   (H, H)         encoder-half of attn weight, pre-transposed
    # v_ref:    (1, H)         f32 scoring vector
    # out_ref:  (b_blk, T)     softmax attention weights (lane-dense slab)
    T, b_blk, H = enc_ref.shape

    # Encoder-side projection as one (T*b_blk, H) @ (H, H) MXU matmul.
    # b_blk is always a multiple of 8, so this reshape is layout-preserving.
    enc2d = enc_ref[...].reshape(T * b_blk, H)
    enc_proj = jnp.dot(enc2d, we_ref[...], preferred_element_type=jnp.float32)
    enc_proj = enc_proj.reshape(T, b_blk, H)

    # Add the precomputed hidden projection (broadcast over the T axis);
    # tanh / softmax math stays in f32.
    energy = jnp.tanh(enc_proj + hidp_ref[...][None, :, :])

    # scores[t, b] = v . energy[t, b]  -- VPU multiply + lane reduce,
    # keeps the MXU slot free, no transpose of the big energy tensor.
    scores = jnp.sum(energy * v_ref[...], axis=-1)          # (T, b_blk)

    # Small XLU transpose so the softmax reduces over lanes and the output
    # slab is lane-dense in T.
    scores = scores.T                                        # (b_blk, T)

    scores = scores - jnp.max(scores, axis=-1, keepdims=True)
    e = jnp.exp(scores)
    denom = jnp.sum(e, axis=-1, keepdims=True)
    p = e * pl.reciprocal(denom, approx=False)               # EUP slot

    out_ref[...] = p.astype(out_ref.dtype)


def _vmem_capacity_bytes():
    try:
        info = pltpu.get_tpu_info()
        cap = getattr(info, "vmem_capacity_bytes", None)
        if cap:
            return int(cap)
    except Exception:
        pass
    return 64 * 1024 * 1024   # conservative: v7x per-TensorCore VMEM


def _pick_b_blk(B, T, H, enc_bytes, out_bytes, vmem_cap):
    """Largest multiple-of-8 batch block that fits the VMEM budget."""
    b_ceil = ((B + 7) // 8) * 8
    # Resident (constant-index) weights, assumed double-buffered by Pallas.
    resident = 2 * (H * H * enc_bytes + H * 4)
    # Double-buffered per-batch-row tile bytes: enc + hid_proj + out.
    per_row = 2 * (T * H * enc_bytes + H * 4 + T * out_bytes)
    budget = int(vmem_cap * 0.8) - resident - (2 << 20)
    b_max = budget // per_row if per_row > 0 else b_ceil
    b_max = max(8, (b_max // 8) * 8)
    b_blk = min(b_ceil, b_max)
    # Keep >= 2 grid steps when the batch is big enough so both v7x
    # TensorCores get work (harmless elsewhere: ~0.35 us/step overhead).
    if b_ceil >= 16:
        half = ((b_ceil // 8 + 1) // 2) * 8
        b_blk = min(b_blk, max(8, half))
    return b_blk, resident, per_row


def attention_forward(hidden, encoder_outputs, W, b, v, *, b_blk=None,
                      mxu_dtype=None):
    """hidden: [B, H], encoder_outputs: [T, B, H]  ->  [B, 1, T]."""
    T, B, H = encoder_outputs.shape
    out_dtype = hidden.dtype
    out_bytes = jnp.dtype(out_dtype).itemsize

    # Split the attn Linear:  x @ W.T = hidden @ W[:, :H].T + enc @ W[:, H:].T.
    # The hidden half (+ bias) is independent of T -> one tiny wrapper matmul.
    hid_proj = (hidden @ W[:, :H].T + b).astype(jnp.float32)        # (B, H)
    we_t = W[:, H:].T                                               # (H, H)
    v_row = v.reshape(1, H).astype(jnp.float32)

    enc = encoder_outputs                                           # (T, B, H)
    if mxu_dtype is not None:
        # Pre-cast once in the wrapper: halves HBM bytes of the dominant
        # tensor and the resident weight; MXU runs at full bf16 rate.
        enc = enc.astype(mxu_dtype)
        we_t = we_t.astype(mxu_dtype)
    enc_bytes = jnp.dtype(enc.dtype).itemsize

    vmem_cap = _vmem_capacity_bytes()
    auto_blk, resident, per_row = _pick_b_blk(B, T, H, enc_bytes, out_bytes,
                                              vmem_cap)
    if b_blk is None:
        b_blk = auto_blk
    b_blk = max(8, ((b_blk + 7) // 8) * 8)

    n_steps = pl.cdiv(B, b_blk)
    b_pad = n_steps * b_blk
    if b_pad != B:
        enc = jnp.pad(enc, ((0, 0), (0, b_pad - B), (0, 0)))
        hid_proj = jnp.pad(hid_proj, ((0, b_pad - B), (0, 0)))

    need = resident + per_row * b_blk + (2 << 20)
    vmem_limit = int(min(vmem_cap, max(need, 16 * 1024 * 1024)))

    out = pl.pallas_call(
        _attention_kernel,
        out_shape=jax.ShapeDtypeStruct((b_pad, T), out_dtype),
        grid_spec=pltpu.PrefetchScalarGridSpec(
            num_scalar_prefetch=0,
            grid=(n_steps,),
            in_specs=[
                pl.BlockSpec((b_blk, H), lambda i: (i, 0)),
                pl.BlockSpec((T, b_blk, H), lambda i: (0, i, 0)),
                pl.BlockSpec((H, H), lambda i: (0, 0)),
                pl.BlockSpec((1, H), lambda i: (0, 0)),
            ],
            out_specs=pl.BlockSpec((b_blk, T), lambda i: (i, 0)),
        ),
        compiler_params=pltpu.CompilerParams(
            dimension_semantics=("parallel",),
            vmem_limit_bytes=vmem_limit),
    )(hid_proj, enc, we_t, v_row)

    return out[:B].reshape(B, 1, T)


def attention_reference(hidden, encoder_outputs, W, b, v):
    """Pure-JAX mirror of the PyTorch forward for verification."""
    T = encoder_outputs.shape[0]
    hid = jnp.transpose(jnp.tile(hidden[None], (T, 1, 1)), (1, 0, 2))  # (B,T,H)
    enc = jnp.transpose(encoder_outputs, (1, 0, 2))                    # (B,T,H)
    energy = jnp.tanh(jnp.concatenate([hid, enc], axis=2) @ W.T + b)   # (B,T,H)
    energy = jnp.transpose(energy, (0, 2, 1))                          # (B,H,T)
    vv = jnp.broadcast_to(v[None, None, :], (enc.shape[0], 1, v.shape[0]))
    attn = jnp.matmul(vv, energy)[:, 0, :]                             # (B,T)
    return jax.nn.softmax(attn, axis=1)[:, None, :]                    # (B,1,T)


if __name__ == "__main__":
    B, T, H = 2, 8, 32

    key = jax.random.PRNGKey(0)
    k_hid, k_enc, k_w, k_b, k_v = jax.random.split(key, 5)

    # Deterministic parameter init matching nn.Linear / the module's __init__.
    stdv_lin = 1.0 / math.sqrt(2 * H)   # nn.Linear(2H, H) default init bound
    stdv_v = 1.0 / math.sqrt(H)         # self.v uniform(-stdv, stdv)
    W = jax.random.uniform(k_w, (H, 2 * H), jnp.float32, -stdv_lin, stdv_lin)
    b = jax.random.uniform(k_b, (H,), jnp.float32, -stdv_lin, stdv_lin)
    v = jax.random.uniform(k_v, (H,), jnp.float32, -stdv_v, stdv_v)

    hidden = jax.random.normal(k_hid, (B, H), jnp.float32)
    encoder_outputs = jax.random.normal(k_enc, (T, B, H), jnp.float32)

    out = attention_forward(hidden, encoder_outputs, W, b, v)
    out = jax.block_until_ready(out)

    ref = attention_reference(hidden, encoder_outputs, W, b, v)
    assert out.shape == (B, 1, T), out.shape
    assert jnp.allclose(out, ref, atol=1e-5, rtol=1e-5), (
        f"max abs err {jnp.max(jnp.abs(out - ref))}")

    print("KERNEL_OK")
</pallas_src>

<mosaic_0001>
module attributes {stable_mosaic.version = 11 : i64} {
  func.func @_attention_kernel(%arg0: i32, %arg1: memref<8x32xf32, #tpu.memory_space<vmem>>, %arg2: memref<8x8x32xf32, #tpu.memory_space<vmem>>, %arg3: memref<32x32xf32, #tpu.memory_space<vmem>>, %arg4: memref<1x32xf32, #tpu.memory_space<vmem>>, %arg5: memref<8x8xf32, #tpu.memory_space<vmem>>) attributes {dimension_semantics = [#tpu.dimension_semantics<parallel>], iteration_bounds = array<i64: 1>, scalar_prefetch = 0 : i64, scratch_operands = 0 : i64, tpu.core_type = #tpu.core_type<tc>, window_params = [{transform_indices = @transform_0, window_bounds = array<i64: 8, 32>}, {transform_indices = @transform_1, window_bounds = array<i64: 8, 8, 32>}, {pipeline_mode = #tpu.pipeline_mode<synchronous>, transform_indices = @transform_2, window_bounds = array<i64: 32, 32>}, {pipeline_mode = #tpu.pipeline_mode<synchronous>, transform_indices = @transform_3, window_bounds = array<i64: 1, 32>}, {transform_indices = @transform_4, window_bounds = array<i64: 8, 8>}]} {
    %c0 = arith.constant 0 : index
    %c0_0 = arith.constant 0 : index
    %c0_1 = arith.constant 0 : index
    %0 = vector.load %arg2[%c0, %c0_0, %c0_1] : memref<8x8x32xf32, #tpu.memory_space<vmem>>, vector<8x8x32xf32>
    %1 = vector.shape_cast %0 : vector<8x8x32xf32> to vector<64x32xf32>
    %c0_2 = arith.constant 0 : index
    %c0_3 = arith.constant 0 : index
    %2 = vector.load %arg3[%c0_2, %c0_3] : memref<32x32xf32, #tpu.memory_space<vmem>>, vector<32x32xf32>
    %cst = arith.constant dense<0.000000e+00> : vector<64x32xf32>
    %3 = tpu.matmul %1, %2, %cst {dimension_numbers = #tpu.dot_dimension_numbers<[1], [0], [0], [1], [0, 0, 1, 1], [], []>} : vector<64x32xf32>, vector<32x32xf32>, vector<64x32xf32> -> vector<64x32xf32>
    %4 = vector.shape_cast %3 : vector<64x32xf32> to vector<8x8x32xf32>
    %c0_4 = arith.constant 0 : index
    %c0_5 = arith.constant 0 : index
    %5 = vector.load %arg1[%c0_4, %c0_5] : memref<8x32xf32, #tpu.memory_space<vmem>>, vector<8x32xf32>
    %6 = vector.shape_cast %5 : vector<8x32xf32> to vector<1x8x32xf32>
    %7 = vector.broadcast %6 : vector<1x8x32xf32> to vector<8x8x32xf32>
    %8 = arith.addf %4, %7 : vector<8x8x32xf32>
    %9 = math.tanh %8 : vector<8x8x32xf32>
    %c0_6 = arith.constant 0 : index
    %c0_7 = arith.constant 0 : index
    %10 = vector.load %arg4[%c0_6, %c0_7] : memref<1x32xf32, #tpu.memory_space<vmem>>, vector<1x32xf32>
    %11 = vector.shape_cast %10 : vector<1x32xf32> to vector<1x1x32xf32>
    %12 = vector.broadcast %11 : vector<1x1x32xf32> to vector<8x8x32xf32>
    %13 = arith.mulf %9, %12 : vector<8x8x32xf32>
    %cst_8 = arith.constant dense<0.000000e+00> : vector<8x8xf32>
    %14 = vector.multi_reduction <add>, %13, %cst_8 [2] : vector<8x8x32xf32> to vector<8x8xf32>
    %15 = tpu.transpose %14, [1, 0] : vector<8x8xf32> -> vector<8x8xf32>
    %cst_9 = arith.constant dense<0xFF800000> : vector<8xf32>
    %16 = vector.multi_reduction <maximumf>, %15, %cst_9 [1] : vector<8x8xf32> to vector<8xf32>
    %17 = vector.shape_cast %16 : vector<8xf32> to vector<8x1xf32>
    %18 = vector.broadcast %17 : vector<8x1xf32> to vector<8x8xf32>
    %19 = arith.subf %15, %18 : vector<8x8xf32>
    %20 = math.exp %19 : vector<8x8xf32>
    %cst_10 = arith.constant dense<0.000000e+00> : vector<8xf32>
    %21 = vector.multi_reduction <add>, %20, %cst_10 [1] : vector<8x8xf32> to vector<8xf32>
    %22 = vector.shape_cast %21 : vector<8xf32> to vector<8x1xf32>
    %23 = tpu.reciprocal %22 : vector<8x1xf32> -> vector<8x1xf32>
    %24 = vector.broadcast %23 : vector<8x1xf32> to vector<8x8xf32>
    %25 = arith.mulf %20, %24 : vector<8x8xf32>
    %c0_11 = arith.constant 0 : index
    %c0_12 = arith.constant 0 : index
    %26 = vector.load %arg5[%c0_11, %c0_12] : memref<8x8xf32, #tpu.memory_space<vmem>>, vector<8x8xf32>
    tpu.vector_store %arg5[%c0_11, %c0_12], %25 {strides = array<i32>} : memref<8x8xf32, #tpu.memory_space<vmem>>, vector<8x8xf32>,
    return
  }
  func.func @transform_0(%arg0: i32) -> (i32, i32) {
    %c0_i32 = arith.constant 0 : i32
    %c0_i32_0 = arith.constant 0 : i32
    return %arg0, %c0_i32 : i32, i32
  }
  func.func @transform_1(%arg0: i32) -> (i32, i32, i32) {
    %c0_i32 = arith.constant 0 : i32
    %c0_i32_0 = arith.constant 0 : i32
    %c0_i32_1 = arith.constant 0 : i32
    return %c0_i32, %arg0, %c0_i32_0 : i32, i32, i32
  }
  func.func @transform_2(%arg0: i32) -> (i32, i32) {
    %c0_i32 = arith.constant 0 : i32
    %c0_i32_0 = arith.constant 0 : i32
    %c0_i32_1 = arith.constant 0 : i32
    return %c0_i32, %c0_i32_0 : i32, i32
  }
  func.func @transform_3(%arg0: i32) -> (i32, i32) {
    %c0_i32 = arith.constant 0 : i32
    %c0_i32_0 = arith.constant 0 : i32
    %c0_i32_1 = arith.constant 0 : i32
    return %c0_i32, %c0_i32_0 : i32, i32
  }
  func.func @transform_4(%arg0: i32) -> (i32, i32) {
    %c0_i32 = arith.constant 0 : i32
    %c0_i32_0 = arith.constant 0 : i32
    return %arg0, %c0_i32 : i32, i32
  }
}

</mosaic_0001>

<bundles_post_ra>
// kernel: tpu_custom_call.1
= control target key start
LH: loop header
LB: loop body
LE: loop exit
PB: predicated region body
PF: predicated region fallthrough
CT: control target
= control target key end

     0   :  { %9 = vsyncpa [#allocation3], 0  ;;  %s654_s0 = inlined_call_operand.hbm [shape: f32[8,32], index: 0, kind: input, shape index: {}]   ;;  %s655_s1 = inlined_call_operand.hbm [shape: f32[8,8,32], index: 1, kind: input, shape index: {}]   ;;  %s656_s2 = inlined_call_operand.hbm [shape: f32[32,32], index: 2, kind: input, shape index: {}]   ;;  %s657_s3 = inlined_call_operand.vmem [shape: f32[1,32], index: 3, kind: input, shape index: {}]   ;;  %s658_s4 = inlined_call_operand.hbm [shape: f32[8,8], index: 4, kind: output, shape index: {}]  }
   0x1   :  { %10 = vsyncpa [#allocation6], 0 }
   0x2   :  { %11 = vsyncpa [#allocation4], 0  ;;  %s547_s15 = smov [#allocation5]   ;;  %s453_s19 = scalar_lea.hbm %s655_s1, 1024 }
   0x3   :  { %s27_s16 = sshll.u32 %s547_s15, 4  ;;  %p454_p0 = scmp.ne.s32.totalorder %s655_s1, %s453_s19  ;;  %s28_s16 = int_to_ptr.vmem [resolvable:$true] %s27_s16 }
   0x4   :  { %p457_p1 = scmp.lt.u32.totalorder %s453_s19, %s655_s1 }
   0x6   :  { %p459_p2 = pnand %p457_p1, %p454_p0 }
   0x8   :  { %462 = shalt.err (!%p459_p2)
}
   0x9   :  { %s463_s24 = scalar_lea.vmem %s28_s16, 1024  ;;  %p468_p4 = scmp.lt.s32.totalorder %s28_s16, %s28_s16 }
   0xa   :  { %p464_p3 = scmp.ne.s32.totalorder %s28_s16, %s463_s24  ;;  %p469_p5 = scmp.lt.s32.totalorder %s463_s24, %s463_s24 }
   0xc   :  { %p470_p6 = por %p469_p5, %p468_p4 }
   0xe   :  { %p471_p7 = pnand %p470_p6, %p464_p3 }
  0x10   :  { %474 = shalt.err (!%p471_p7)
}
  0x11   :  { %s548_s25 = smov 128   ;;  %s549_s26 = smov 8  }
  0x12   :  { %33 = dma.hbm_to_vmem [thread:$0]  %s655_s1, 1024, %s28_s16, [#allocation6], %s548_s25, %s548_s25, %s549_s26  }
  0x13   :  { %s550_s29 = smov [#allocation2]   ;;  %s551_s5 = smov [#allocation7]  }
  0x14   :  { %s18_s30 = sshll.u32 %s550_s29, 4  ;;  %s39_s6 = sshll.u32 %s551_s5, 4  ;;  %s19_s30 = int_to_ptr.vmem [resolvable:$true] %s18_s30  ;;  %s40_s6 = int_to_ptr.vmem [resolvable:$true] %s39_s6 }
  0x15   :  { %s475_s9 = scalar_lea.hbm %s654_s0, 128 }
  0x16   :  { %p476_p8 = scmp.ne.s32.totalorder %s654_s0, %s475_s9  ;;  %p479_p9 = scmp.lt.u32.totalorder %s475_s9, %s654_s0 }
  0x18   :  { %p481_p10 = pnand %p479_p9, %p476_p8 }
  0x1a   :  { %484 = shalt.err (!%p481_p10)
}
  0x1b   :  { %s485_s1 = scalar_lea.vmem %s19_s30, 128  ;;  %p490_p12 = scmp.lt.s32.totalorder %s19_s30, %s19_s30 }
  0x1c   :  { %p486_p11 = scmp.ne.s32.totalorder %s19_s30, %s485_s1  ;;  %p491_p13 = scmp.lt.s32.totalorder %s485_s1, %s485_s1 }
  0x1e   :  { %p492_p0 = por %p491_p13, %p490_p12 }
  0x20   :  { %p493_p1 = pnand %p492_p0, %p486_p11 }
  0x22   :  { %496 = shalt.err (!%p493_p1)
}
  0x23   :  { %21 = dma.hbm_to_vmem [thread:$0]  %s654_s0, 128, %s19_s30, [#allocation3]  }
  0x24   :  { %s497_s18 = scalar_lea.hbm %s656_s2, 512 }
  0x25   :  { %p498_p2 = scmp.ne.s32.totalorder %s656_s2, %s497_s18  ;;  %p501_p3 = scmp.lt.u32.totalorder %s497_s18, %s656_s2 }
  0x27   :  { %p503_p4 = pnand %p501_p3, %p498_p2 }
  0x29   :  { %506 = shalt.err (!%p503_p4)
}
  0x2a   :  { %s507_s23 = scalar_lea.vmem %s40_s6, 512  ;;  %p512_p6 = scmp.lt.s32.totalorder %s40_s6, %s40_s6 }
  0x2b   :  { %p508_p5 = scmp.ne.s32.totalorder %s40_s6, %s507_s23  ;;  %p513_p7 = scmp.lt.s32.totalorder %s507_s23, %s507_s23 }
  0x2d   :  { %p514_p8 = por %p513_p7, %p512_p6 }
  0x2f   :  { %p515_p9 = pnand %p514_p8, %p508_p5 }
  0x31   :  { %518 = shalt.err (!%p515_p9)
}
  0x32   :  { %45 = dma.hbm_to_vmem [thread:$0]  %s656_s2, 512, %s40_s6, [#allocation6], %s548_s25, %s548_s25, %s549_s26  }
  0x33   :  { %541 = dma.done.wait [#allocation3], 128  }
  0x34   :  { %542 = vsyncadd [#allocation3], 4294967168 }
  0x35   :  { %543 = dma.done.wait [#allocation6], 1536  }
  0x36   :  { %544 = vsyncadd [#allocation6], 4294965760  ;;  %vm69_vm0 = vcmask 261120   ;;  %v65_v0 = vld [vmem:[#allocation7] sm:$0xff]  ;;  %v66_v1 = vld [vmem:[#allocation7 + $0x8] sm:$0xff]  ;;  %v263_v56 = vlaneseq  ;;  %vm297_vm1 = vcmask 1041409  }
  0x37   :  { %v67_v2 = vld [vmem:[#allocation7 + $0x10] sm:$0xff]  ;;  %v414_v3 = vpack.c.bf16 %v66_v1, %v65_v0  ;;  %v68_v4 = vld [vmem:[#allocation7 + $0x18] sm:$0xff]  ;;  %v57_v5 = vld [vmem:[#allocation5] sm:$0xff]  ;;  %vm299_vm2 = vcmask 1042434   ;;  %vm301_vm3 = vcmask 1043459   ;;  %vm303_vm4 = vcmask 1044484  }
  0x38   :  { %v418_v6 = vpack.c.bf16 %v68_v4, %v67_v2  ;;  %402 = vmatprep.mubr.msk.f32.mxu0 %vm69_vm0, %v57_v5  ;;  %v61_v7 = vld [vmem:[#allocation5 + $0x20] sm:$0xff]  ;;  %v58_v8 = vld [vmem:[#allocation5 + $0x8] sm:$0xff]  ;;  %v59_v10 = vld [vmem:[#allocation5 + $0x10] sm:$0xff]  ;;  %v264_v57 = vand.u32 127, %v263_v56  ;;  %v266_v58 = vshrl.u32 %v263_v56, 7  ;;  %vm305_vm5 = vcmask 1045509  }
  0x39   :  { %415 = vmatprep.subr.bf16.mxu0 %v414_v3  ;;  %422 = vmatprep.subr.bf16.mxu1 %v414_v3  ;;  %v62_v9 = vld [vmem:[#allocation5 + $0x28] sm:$0xff]  ;;  %v63_v11 = vld [vmem:[#allocation5 + $0x30] sm:$0xff]  ;;  %v60_v12 = vld [vmem:[#allocation5 + $0x18] sm:$0xff]  ;;  %vm307_vm6 = vcmask 1046534   ;;  %vm309_vm7 = vcmask 1047559   ;;  %vm344_vm8 = vcmask 64512  }
  0x3a   :  { %417 = vmatpush3.bf16.msra.mxu0 %v414_v3  ;;  %424 = vmatpush3.bf16.msra.mxu1 %v414_v3  ;;  %v64_v13 = vld [vmem:[#allocation5 + $0x38] sm:$0xff]  ;;  %v267_v60 = vsub.s32 %v264_v57, %v266_v58 }
  0x3b   :  { %419 = vmatprep.subr.bf16.mxu0 %v418_v6  ;;  %423 = vmatprep.subr.bf16.mxu1 %v418_v6  ;;  %v199_v14 = vld [vmem:[#allocation2] sm:$0xff] }
  0x3c   :  { %408 = vmatprep.mubr.msk.f32.mxu1 %vm69_vm0, %v61_v7  ;;  %v381_v31 = vld [vmem:[%s657_s3] ss:$0 sm:$0xff]  ;;  %s552_s3 = smov [#allocation8]  }
  0x3d   :  { %s363_s26 = sshll.u32 %s552_s3, 4  ;;  %s364_s26 = int_to_ptr.vmem [resolvable:$true] %s363_s26 }
  0x3e   :  { %421 = vmatpush3.bf16.msra.mxu0 %v418_v6  ;;  %425 = vmatpush3.bf16.msra.mxu1 %v418_v6  ;;  %s519_s27 = scalar_lea.vmem %s364_s26, 128  ;;  %p524_p11 = scmp.lt.s32.totalorder %s364_s26, %s364_s26 }
  0x3f   :  { %p520_p10 = scmp.ne.s32.totalorder %s364_s26, %s519_s27  ;;  %p525_p12 = scmp.lt.s32.totalorder %s519_s27, %s519_s27 }
  0x41   :  { %403 = vmatmul.mubr.msk.f32.vlgmr.msra.gmra.mrb[0].mxu0 %vm69_vm0, %v58_v8  ;;  %409 = vmatmul.mubr.msk.f32.vlgmr.msra.gmra.mrb[0].mxu1 %vm69_vm0, %v62_v9  ;;  %p526_p13 = por %p525_p12, %p524_p11 }
  0x42   :  { %405 = vmatprep.mubr.msk.f32.mxu0 %vm69_vm0, %v59_v10  ;;  %411 = vmatprep.mubr.msk.f32.mxu1 %vm69_vm0, %v63_v11 }
  0x43   :  { %p527_p0 = pnand %p526_p13, %p520_p10 }
  0x45   :  { %406 = vmatmul.mubr.msk.f32.gmra.mrb[2].mxu0 %vm69_vm0, %v60_v12  ;;  %412 = vmatmul.mubr.msk.f32.gmra.mrb[2].mxu1 %vm69_vm0, %v64_v13 }
 0x114   :  { %v404_v15 = vpop.f32.mrb[0].mxu0  ;;  %v410_v16 = vpop.f32.mrb[0].mxu1 }
 0x115   :  { %v201_v17 = vadd.f32 %v404_v15, %v199_v14  ;;  %v160_v18 = vpop.f32.mrb[1].mxu0  ;;  %v180_v19 = vpop.f32.mrb[1].mxu1  ;;  %v205_v29 = vadd.f32 %v410_v16, %v199_v14 }
 0x116   :  { %v200_v20 = vadd.f32 %v199_v14, %v160_v18  ;;  %v204_v21 = vadd.f32 %v199_v14, %v180_v19 }
 0x117   :  { %433 = vtanh.f32 %v201_v17 }
 0x118   :  { %435 = vtanh.f32 %v200_v20  ;;  %v407_v22 = vpop.f32.mrb[2].mxu0  ;;  %v413_v23 = vpop.f32.mrb[2].mxu1 }
 0x119   :  { %v203_v24 = vadd.f32 %v407_v22, %v199_v14  ;;  %v170_v25 = vpop.f32.mrb[3].mxu0  ;;  %v190_v26 = vpop.f32.mrb[3].mxu1  ;;  %437 = vtanh.f32 %v204_v21  ;;  %v207_v30 = vadd.f32 %v413_v23, %v199_v14 }
 0x11a   :  { %v202_v27 = vadd.f32 %v199_v14, %v170_v25  ;;  %v206_v28 = vadd.f32 %v199_v14, %v190_v26 }
 0x11b   :  { %439 = vtanh.f32 %v203_v24 }
 0x11c   :  { %441 = vtanh.f32 %v202_v27 }
 0x11d   :  { %443 = vtanh.f32 %v206_v28 }
 0x11e   :  { %445 = vtanh.f32 %v205_v29 }
 0x11f   :  { %447 = vtanh.f32 %v207_v30 }
 0x121   :  { %v434_v32 = vpop.eup %433 }
 0x122   :  { %v436_v33 = vpop.eup %435  ;;  %v224_v34 = vmul.f32 %v434_v32, %v381_v31 }
 0x123   :  { %v438_v35 = vpop.eup %437  ;;  %v223_v37 = vmul.f32 %v436_v33, %v381_v31 }
 0x124   :  { %v234_v36 = vsel %vm69_vm0, %v224_v34, 0.0  ;;  %v227_v41 = vmul.f32 %v438_v35, %v381_v31 }
 0x125   :  { %v440_v38 = vpop.eup %439  ;;  %235 = vadd.xlane.f32.xlu0 %v234_v36  ;;  %v231_v43 = vsel %vm69_vm0, %v223_v37, 0.0 }
 0x126   :  { %v442_v39 = vpop.eup %441  ;;  %v226_v40 = vmul.f32 %v440_v38, %v381_v31  ;;  %v243_v47 = vsel %vm69_vm0, %v227_v41, 0.0 }
 0x127   :  { %v444_v42 = vpop.eup %443  ;;  %v225_v45 = vmul.f32 %v442_v39, %v381_v31 }
 0x128   :  { %v240_v44 = vsel %vm69_vm0, %v226_v40, 0.0  ;;  %v446_v46 = vpop.eup %445  ;;  %v229_v48 = vmul.f32 %v444_v42, %v381_v31 }
 0x129   :  { %232 = vadd.xlane.f32.xlu0 %v231_v43  ;;  %241 = vadd.xlane.f32.xlu1 %v240_v44  ;;  %v237_v49 = vsel %vm69_vm0, %v225_v45, 0.0  ;;  %v228_v50 = vmul.f32 %v446_v46, %v381_v31  ;;  %v448_v51 = vpop.eup %447 }
 0x12a   :  { %v249_v52 = vsel %vm69_vm0, %v229_v48, 0.0  ;;  %v230_v54 = vmul.f32 %v448_v51, %v381_v31 }
 0x12b   :  { %v246_v53 = vsel %vm69_vm0, %v228_v50, 0.0 }
 0x12c   :  { %v252_v55 = vsel %vm69_vm0, %v230_v54, 0.0 }
 0x12d   :  { %238 = vadd.xlane.f32.xlu1 %v237_v49  ;;  %244 = vadd.xlane.f32.xlu0 %v243_v47 }
 0x131   :  { %247 = vadd.xlane.f32.xlu1 %v246_v53  ;;  %250 = vadd.xlane.f32.xlu0 %v249_v52 }
 0x135   :  { %253 = vadd.xlane.f32.xlu1 %v252_v55 }
 0x1b2   :  { %v236_v59 = vpop.xlane.xlu0 %235 }
 0x1b3   :  { %v272_v0 = vrot.slane %v236_v59, %v267_v60 }
 0x1b6   :  { %v233_v61 = vpop.xlane.xlu0 %232  ;;  %v242_v62 = vpop.xlane.xlu1 %241 }
 0x1b7   :  { %v268_v63 = vrot.slane %v233_v61, %v267_v60  ;;  %v280_v6 = vrot.slane %v242_v62, %v267_v60 }
 0x1b9   :  { %v298_v5 = vsel %vm297_vm1, %v272_v0, %v268_v63 }
 0x1ba   :  { %v239_v1 = vpop.xlane.xlu1 %238  ;;  %v245_v2 = vpop.xlane.xlu0 %244 }
 0x1bb   :  { %v276_v3 = vrot.slane %v239_v1, %v267_v60  ;;  %v284_v4 = vrot.slane %v245_v2, %v267_v60 }
 0x1bd   :  { %v300_v7 = vsel %vm299_vm2, %v276_v3, %v298_v5 }
 0x1be   :  { %v302_v8 = vsel %vm301_vm3, %v280_v6, %v300_v7  ;;  %v248_v9 = vpop.xlane.xlu1 %247  ;;  %v251_v10 = vpop.xlane.xlu0 %250 }
 0x1bf   :  { %v304_v11 = vsel %vm303_vm4, %v284_v4, %v302_v8  ;;  %v288_v12 = vrot.slane %v248_v9, %v267_v60  ;;  %v292_v13 = vrot.slane %v251_v10, %v267_v60 }
 0x1c1   :  { %v306_v14 = vsel %vm305_vm5, %v288_v12, %v304_v11 }
 0x1c2   :  { %v254_v15 = vpop.xlane.xlu1 %253  ;;  %v308_v17 = vsel %vm307_vm6, %v292_v13, %v306_v14 }
 0x1c3   :  { %v296_v16 = vrot.slane %v254_v15, %v267_v60 }
 0x1c5   :  { %v310_v18 = vsel %vm309_vm7, %v296_v16, %v308_v17 }
 0x1c6   :  { %312 = vxpose.xlu0.b32.start.end [1/1] (short) (narrow) %v310_v18, 8 }
 0x246   :  { %v328_v19 = vpop.trf.xlu0 }
 0x247   :  { %v345_v20 = vsel %vm344_vm8, %v328_v19, -inf }
 0x248   :  { %346 = vmax.xlane.f32.xlu1 %v345_v20 }
 0x2d5   :  { %v347_v21 = vpop.xlane.xlu1 %346 }
 0x2d6   :  { %v348_v22 = vsub.f32 %v328_v19, %v347_v21 }
 0x2d8   :  { %v349_v23 = vmul.f32 1.442695, %v348_v22 }
 0x2da   :  { %449 = vpow2.f32 %v349_v23 }
 0x2e4   :  { %v450_v24 = vpop.eup %449 }
 0x2e5   :  { %v351_v25 = vsel %vm344_vm8, %v450_v24, 0.0 }
 0x2e6   :  { %352 = vadd.xlane.f32.xlu1 %v351_v25 }
 0x373   :  { %v353_v26 = vpop.xlane.xlu1 %352 }
 0x374   :  { %451 = vrcp.f32 %v353_v26 }
 0x37e   :  { %v452_v27 = vpop.eup %451 }
 0x37f   :  { %v355_v28 = vmul.f32 %v452_v27, %v450_v24 }
 0x381   :  { %356 = vst.msk [vmem:[#allocation8] sm:$0xff] %vm344_vm8, %v355_v28 }
 0x382   :  { %530 = shalt.err (!%p527_p0)
}
 0x383   :  { %s531_s30 = scalar_lea.hbm %s658_s4, 128 }
 0x384   :  { %p532_p1 = scmp.ne.s32.totalorder %s658_s4, %s531_s30  ;;  %p535_p2 = scmp.lt.u32.totalorder %s531_s30, %s658_s4 }
 0x386   :  { %p537_p3 = pnand %p535_p2, %p532_p1 }
 0x388   :  { %540 = shalt.err (!%p537_p3)
}
 0x389   :  { %366 = dma.vmem_to_hbm [thread:$0]  %s364_s26, 128, %s658_s4, [#allocation4]  }
 0x38a   :  { %545 = dma.done.wait [#allocation4], 128  }
 0x38b   :  { %546 = vsyncadd [#allocation4], 4294967168 }
 0x38c   :  { %370 = vsyncpa [#allocation3], 1 }
 0x38d   :  { %371 = vsyncpa [#allocation6], 1 }
 0x38e   :  { %372 = vsyncpa [#allocation4], 1 }

</bundles_post_ra>
